<compile_context>
chip_gen: v7x
topology: tpu7x:2x2x1
jax: 0.10.0
libtpu: 0.0.40
codegen_flags: <defaults>
</compile_context>

<pallas_src>
import functools

import jax
import jax.numpy as jnp
from jax.experimental import pallas as pl
from jax.experimental.pallas import tpu as pltpu

LANES = 128
SUBLANES = 8
MAX_BLOCK_ROWS = 2048                    # f32 tile = 2048 x 128 x 4 B = 1 MiB / input block
VMEM_LIMIT_BYTES = 32 * 1024 * 1024      # safe on v5e/v6e (128 MiB) and v7x (64 MiB)


def _bce_with_logits(x, t):
    # Numerically stable BCE with logits: max(x, 0) - x*t + log(1 + exp(-|x|))
    return jnp.maximum(x, 0.0) - x * t + jnp.log1p(jnp.exp(-jnp.abs(x)))


def _focal_sum_kernel(x_ref, t_ref, out_ref, *, block_rows, blocks_total, rows_valid):
    s = pl.program_id(0)                 # shard (parallel axis; one per TensorCore on v7x)
    j = pl.program_id(1)                 # block within shard (reduction axis)
    b = s * pl.num_programs(1) + j       # global block index

    @pl.when(j == 0)
    def _():
        out_ref[...] = jnp.zeros_like(out_ref)

    x = x_ref[...].astype(jnp.float32)
    t = t_ref[...].astype(jnp.float32)
    bce = _bce_with_logits(x, t)

    # (block_rows, 128) -> (block_rows//8, 8, 128); summing over the leading axis is
    # a chain of plain vector adds (no cross-lane / cross-sublane XLU reduction).
    def _partial(v):
        return jnp.sum(v.reshape(block_rows // SUBLANES, SUBLANES, LANES), axis=0)

    # Full interior blocks: no masking work at all.
    @pl.when(b < blocks_total - 1)
    def _():
        out_ref[...] += _partial(bce)[None]

    # Last valid block only: mask rows past the end of the input. Blocks with
    # b >= blocks_total (possible when shards don't divide evenly) contribute nothing.
    # Note: mask uses row indices (element_index / 128), so int32 is ample.
    @pl.when(b == blocks_total - 1)
    def _():
        row = jax.lax.broadcasted_iota(jnp.int32, (block_rows, LANES), 0)
        valid = (b * block_rows + row) < rows_valid
        out_ref[...] += _partial(jnp.where(valid, bce, 0.0))[None]


def _focal_epilogue(total_sum, n, alpha, gamma):
    mean_bce = total_sum * jnp.float32(1.0 / n)      # multiply by reciprocal, not divide
    bce_exp = jnp.exp(-mean_bce)
    base = 1.0 - bce_exp
    g = float(gamma)
    if g == int(g) and 0 <= int(g) <= 8:             # small integer gamma: repeated multiply
        pow_term = jnp.float32(1.0)
        for _ in range(int(g)):
            pow_term = pow_term * base
    else:
        pow_term = base ** g
    return jnp.float32(alpha) * pow_term * mean_bce


def focal_loss(inputs, targets, alpha=0.25, gamma=2):
    assert inputs.shape == targets.shape
    n = inputs.size
    assert n > 0

    x = inputs.reshape(-1)               # free (row-major flatten), native dtype kept
    t = targets.reshape(-1)

    rows_total = n // LANES
    rows_main = (rows_total // SUBLANES) * SUBLANES   # rows handled by the kernel (mult of 8)
    n_main = rows_main * LANES

    # Sub-(8,128)-tile remainder (< 1024 elements): fold in with plain jnp so the
    # kernel never needs a padded copy of the (large) main region.
    if n_main < n:
        x_tail = x[n_main:].astype(jnp.float32)
        t_tail = t[n_main:].astype(jnp.float32)
        tail_sum = jnp.sum(_bce_with_logits(x_tail, t_tail))
    else:
        tail_sum = jnp.float32(0.0)

    if rows_main == 0:
        # Input smaller than one (8, 128) tile: pure-jnp fallback.
        return _focal_epilogue(tail_sum, n, alpha, gamma)

    if n_main == n:
        x_main = x.reshape(rows_main, LANES)          # zero-copy path (common case)
        t_main = t.reshape(rows_main, LANES)
    else:
        x_main = jax.lax.slice(x, (0,), (n_main,)).reshape(rows_main, LANES)
        t_main = jax.lax.slice(t, (0,), (n_main,)).reshape(rows_main, LANES)

    block_rows = min(MAX_BLOCK_ROWS, rows_main)       # multiple of 8 by construction
    blocks_total = pl.cdiv(rows_main, block_rows)
    num_shards = 2 if blocks_total >= 2 else 1        # lets v7x use both TensorCores
    blocks_per_shard = pl.cdiv(blocks_total, num_shards)

    def in_index_map(si, ji):
        bi = si * blocks_per_shard + ji
        # Clamp so a shard whose tail runs past the last block re-reads a valid block
        # (its contribution is skipped inside the kernel).
        return (jnp.minimum(bi, blocks_total - 1), 0)

    kernel = functools.partial(
        _focal_sum_kernel,
        block_rows=block_rows,
        blocks_total=blocks_total,
        rows_valid=rows_main,
    )

    partials = pl.pallas_call(
        kernel,
        out_shape=jax.ShapeDtypeStruct((num_shards, SUBLANES, LANES), jnp.float32),
        grid_spec=pltpu.PrefetchScalarGridSpec(
            num_scalar_prefetch=0,
            grid=(num_shards, blocks_per_shard),
            in_specs=[
                pl.BlockSpec((block_rows, LANES), in_index_map),
                pl.BlockSpec((block_rows, LANES), in_index_map),
            ],
            out_specs=pl.BlockSpec((1, SUBLANES, LANES), lambda si, ji: (si, 0, 0)),
        ),
        compiler_params=pltpu.CompilerParams(
            dimension_semantics=("parallel", "arbitrary"),
            vmem_limit_bytes=VMEM_LIMIT_BYTES,
        ),
    )(x_main, t_main)

    total = jnp.sum(partials) + tail_sum
    return _focal_epilogue(total, n, alpha, gamma)


def _focal_loss_ref(inputs, targets, alpha=0.25, gamma=2):
    x = inputs.astype(jnp.float32)
    t = targets.astype(jnp.float32)
    bce = jnp.mean(_bce_with_logits(x, t))
    return alpha * (1.0 - jnp.exp(-bce)) ** gamma * bce


if __name__ == "__main__":
    key = jax.random.PRNGKey(0)
    k1, k2 = jax.random.split(key)
    # Small segmentation-style logits map: NCHW (2, 4, 16, 16).
    logits = jax.random.normal(k1, (2, 4, 16, 16), dtype=jnp.float32)
    targets = (jax.random.uniform(k2, (2, 4, 16, 16)) > 0.5).astype(jnp.float32)

    loss = focal_loss(logits, targets, alpha=0.25, gamma=2)
    jax.block_until_ready(loss)

    ref = _focal_loss_ref(logits, targets, alpha=0.25, gamma=2)
    assert jnp.allclose(loss, ref, rtol=1e-5, atol=1e-6), (loss, ref)
    print("KERNEL_OK")
</pallas_src>

<mosaic_0001>
module attributes {stable_mosaic.version = 11 : i64} {
  func.func @_focal_sum_kernel(%arg0: i32, %arg1: i32, %arg2: memref<16x128xf32, #tpu.memory_space<vmem>>, %arg3: memref<16x128xf32, #tpu.memory_space<vmem>>, %arg4: memref<1x8x128xf32, #tpu.memory_space<vmem>>) attributes {dimension_semantics = [#tpu.dimension_semantics<parallel>, #tpu.dimension_semantics<arbitrary>], iteration_bounds = array<i64: 1, 1>, scalar_prefetch = 0 : i64, scratch_operands = 0 : i64, tpu.core_type = #tpu.core_type<tc>, window_params = [{transform_indices = @transform_0, window_bounds = array<i64: 16, 128>}, {transform_indices = @transform_1, window_bounds = array<i64: 16, 128>}, {transform_indices = @transform_2, window_bounds = array<i64: 1, 8, 128>}]} {
    %c1_i32 = arith.constant 1 : i32
    %0 = arith.muli %arg0, %c1_i32 : i32
    %1 = arith.addi %0, %arg1 : i32
    %c0_i32 = arith.constant 0 : i32
    %2 = arith.cmpi eq, %arg1, %c0_i32 : i32
    %3 = arith.extui %2 : i1 to i32
    %c0_i32_0 = arith.constant 0 : i32
    %4 = arith.cmpi ne, %3, %c0_i32_0 : i32
    scf.if %4 {
      %cst_9 = arith.constant 0.000000e+00 : f32
      %23 = vector.broadcast %cst_9 : f32 to vector<1x8x128xf32>
      %c0_10 = arith.constant 0 : index
      %c0_11 = arith.constant 0 : index
      %c0_12 = arith.constant 0 : index
      %24 = vector.load %arg4[%c0_10, %c0_11, %c0_12] : memref<1x8x128xf32, #tpu.memory_space<vmem>>, vector<1x8x128xf32>
      tpu.vector_store %arg4[%c0_10, %c0_11, %c0_12], %23 {strides = array<i32>} : memref<1x8x128xf32, #tpu.memory_space<vmem>>, vector<1x8x128xf32>,
    } else {
    }
    %c0 = arith.constant 0 : index
    %c0_1 = arith.constant 0 : index
    %5 = vector.load %arg2[%c0, %c0_1] : memref<16x128xf32, #tpu.memory_space<vmem>>, vector<16x128xf32>
    %c0_2 = arith.constant 0 : index
    %c0_3 = arith.constant 0 : index
    %6 = vector.load %arg3[%c0_2, %c0_3] : memref<16x128xf32, #tpu.memory_space<vmem>>, vector<16x128xf32>
    %cst = arith.constant 0.000000e+00 : f32
    %7 = vector.broadcast %cst : f32 to vector<16x128xf32>
    %8 = arith.maximumf %5, %7 : vector<16x128xf32>
    %9 = arith.mulf %5, %6 : vector<16x128xf32>
    %10 = arith.subf %8, %9 : vector<16x128xf32>
    %11 = math.absf %5 : vector<16x128xf32>
    %cst_4 = arith.constant 0.000000e+00 : f32
    %12 = vector.broadcast %cst_4 : f32 to vector<16x128xf32>
    %13 = arith.subf %12, %11 : vector<16x128xf32>
    %14 = math.exp %13 : vector<16x128xf32>
    %15 = math.log1p %14 : vector<16x128xf32>
    %16 = arith.addf %10, %15 : vector<16x128xf32>
    %c0_i32_5 = arith.constant 0 : i32
    %17 = arith.cmpi slt, %1, %c0_i32_5 : i32
    %18 = arith.extui %17 : i1 to i32
    %c0_i32_6 = arith.constant 0 : i32
    %19 = arith.cmpi ne, %18, %c0_i32_6 : i32
    scf.if %19 {
      %c0_9 = arith.constant 0 : index
      %c0_10 = arith.constant 0 : index
      %c0_11 = arith.constant 0 : index
      %23 = vector.load %arg4[%c0_9, %c0_10, %c0_11] : memref<1x8x128xf32, #tpu.memory_space<vmem>>, vector<1x8x128xf32>
      %24 = vector.shape_cast %16 : vector<16x128xf32> to vector<2x8x128xf32>
      %cst_12 = arith.constant dense<0.000000e+00> : vector<8x128xf32>
      %25 = vector.multi_reduction <add>, %24, %cst_12 [0] : vector<2x8x128xf32> to vector<8x128xf32>
      %26 = vector.shape_cast %25 : vector<8x128xf32> to vector<1x8x128xf32>
      %27 = arith.addf %23, %26 : vector<1x8x128xf32>
      %c0_13 = arith.constant 0 : index
      %c0_14 = arith.constant 0 : index
      %c0_15 = arith.constant 0 : index
      %28 = vector.load %arg4[%c0_13, %c0_14, %c0_15] : memref<1x8x128xf32, #tpu.memory_space<vmem>>, vector<1x8x128xf32>
      tpu.vector_store %arg4[%c0_13, %c0_14, %c0_15], %27 {strides = array<i32>} : memref<1x8x128xf32, #tpu.memory_space<vmem>>, vector<1x8x128xf32>,
    } else {
    }
    %c0_i32_7 = arith.constant 0 : i32
    %20 = arith.cmpi eq, %1, %c0_i32_7 : i32
    %21 = arith.extui %20 : i1 to i32
    %c0_i32_8 = arith.constant 0 : i32
    %22 = arith.cmpi ne, %21, %c0_i32_8 : i32
    scf.if %22 {
      %23 = tpu.iota {dimensions = array<i32: 0>} : vector<16x128xi32>
      %c16_i32 = arith.constant 16 : i32
      %24 = arith.muli %1, %c16_i32 : i32
      %25 = vector.broadcast %24 : i32 to vector<16x128xi32>
      %26 = arith.addi %25, %23 : vector<16x128xi32>
      %c16_i32_9 = arith.constant 16 : i32
      %27 = vector.broadcast %c16_i32_9 : i32 to vector<16x128xi32>
      %28 = arith.cmpi slt, %26, %27 : vector<16x128xi32>
      %c0_10 = arith.constant 0 : index
      %c0_11 = arith.constant 0 : index
      %c0_12 = arith.constant 0 : index
      %29 = vector.load %arg4[%c0_10, %c0_11, %c0_12] : memref<1x8x128xf32, #tpu.memory_space<vmem>>, vector<1x8x128xf32>
      %cst_13 = arith.constant 0.000000e+00 : f32
      %30 = vector.broadcast %cst_13 : f32 to vector<16x128xf32>
      %31 = arith.select %28, %16, %30 : vector<16x128xi1>, vector<16x128xf32>
      %32 = vector.shape_cast %31 : vector<16x128xf32> to vector<2x8x128xf32>
      %cst_14 = arith.constant dense<0.000000e+00> : vector<8x128xf32>
      %33 = vector.multi_reduction <add>, %32, %cst_14 [0] : vector<2x8x128xf32> to vector<8x128xf32>
      %34 = vector.shape_cast %33 : vector<8x128xf32> to vector<1x8x128xf32>
      %35 = arith.addf %29, %34 : vector<1x8x128xf32>
      %c0_15 = arith.constant 0 : index
      %c0_16 = arith.constant 0 : index
      %c0_17 = arith.constant 0 : index
      %36 = vector.load %arg4[%c0_15, %c0_16, %c0_17] : memref<1x8x128xf32, #tpu.memory_space<vmem>>, vector<1x8x128xf32>
      tpu.vector_store %arg4[%c0_15, %c0_16, %c0_17], %35 {strides = array<i32>} : memref<1x8x128xf32, #tpu.memory_space<vmem>>, vector<1x8x128xf32>,
    } else {
    }
    return
  }
  func.func @transform_0(%arg0: i32, %arg1: i32) -> (i32, i32) {
    %c1_i32 = arith.constant 1 : i32
    %0 = arith.muli %arg0, %c1_i32 : i32
    %1 = arith.addi %0, %arg1 : i32
    %c0_i32 = arith.constant 0 : i32
    %2 = arith.minsi %1, %c0_i32 : i32
    %c0_i32_0 = arith.constant 0 : i32
    %c0_i32_1 = arith.constant 0 : i32
    return %2, %c0_i32_0 : i32, i32
  }
  func.func @transform_1(%arg0: i32, %arg1: i32) -> (i32, i32) {
    %c1_i32 = arith.constant 1 : i32
    %0 = arith.muli %arg0, %c1_i32 : i32
    %1 = arith.addi %0, %arg1 : i32
    %c0_i32 = arith.constant 0 : i32
    %2 = arith.minsi %1, %c0_i32 : i32
    %c0_i32_0 = arith.constant 0 : i32
    %c0_i32_1 = arith.constant 0 : i32
    return %2, %c0_i32_0 : i32, i32
  }
  func.func @transform_2(%arg0: i32, %arg1: i32) -> (i32, i32, i32) {
    %c0_i32 = arith.constant 0 : i32
    %c0_i32_0 = arith.constant 0 : i32
    %c0_i32_1 = arith.constant 0 : i32
    return %arg0, %c0_i32, %c0_i32_0 : i32, i32, i32
  }
}

</mosaic_0001>

<bundles_post_ra>
// kernel: tpu_custom_call.1
= control target key start
LH: loop header
LB: loop body
LE: loop exit
PB: predicated region body
PF: predicated region fallthrough
CT: control target
= control target key end

     0   :  { %7 = vsyncpa [#allocation3], 0  ;;  %s293_s0 = inlined_call_operand.hbm [shape: f32[16,128], index: 0, kind: input, shape index: {}]   ;;  %s294_s1 = inlined_call_operand.hbm [shape: f32[16,128], index: 1, kind: input, shape index: {}]   ;;  %s295_s2 = inlined_call_operand.hbm [shape: f32[1,8,128], index: 2, kind: output, shape index: {}]  }
   0x1   :  { %8 = vsyncpa [#allocation6], 0 }
   0x2   :  { %9 = vsyncpa [#allocation4], 0  ;;  %s237_s9 = smov [#allocation2]   ;;  %s165_s13 = scalar_lea.hbm %s293_s0, 256 }
   0x3   :  { %s21_s10 = sshll.u32 %s237_s9, 4  ;;  %p166_p0 = scmp.ne.s32.totalorder %s293_s0, %s165_s13  ;;  %s22_s10 = int_to_ptr.vmem [resolvable:$true] %s21_s10 }
   0x4   :  { %p169_p1 = scmp.lt.u32.totalorder %s165_s13, %s293_s0 }
   0x6   :  { %p171_p2 = pnand %p169_p1, %p166_p0 }
   0x8   :  { %174 = shalt.err (!%p171_p2)
}
   0x9   :  { %s175_s18 = scalar_lea.vmem %s22_s10, 256  ;;  %p180_p4 = scmp.lt.s32.totalorder %s22_s10, %s22_s10 }
   0xa   :  { %p176_p3 = scmp.ne.s32.totalorder %s22_s10, %s175_s18  ;;  %p181_p5 = scmp.lt.s32.totalorder %s175_s18, %s175_s18 }
   0xc   :  { %p182_p6 = por %p181_p5, %p180_p4 }
   0xe   :  { %p183_p7 = pnand %p182_p6, %p176_p3 }
  0x10   :  { %186 = shalt.err (!%p183_p7)
}
  0x11   :  { %s238_s19 = smov 128   ;;  %s239_s20 = smov 8  }
  0x12   :  { %27 = dma.hbm_to_vmem [thread:$0]  %s293_s0, 256, %s22_s10, [#allocation3], %s238_s19, %s238_s19, %s239_s20  }
  0x13   :  { %s240_s23 = smov [#allocation5]   ;;  %s187_s27 = scalar_lea.hbm %s294_s1, 256 }
  0x14   :  { %s39_s24 = sshll.u32 %s240_s23, 4  ;;  %p188_p8 = scmp.ne.s32.totalorder %s294_s1, %s187_s27  ;;  %s40_s24 = int_to_ptr.vmem [resolvable:$true] %s39_s24 }
  0x15   :  { %p191_p9 = scmp.lt.u32.totalorder %s187_s27, %s294_s1 }
  0x17   :  { %p193_p10 = pnand %p191_p9, %p188_p8 }
  0x19   :  { %196 = shalt.err (!%p193_p10)
}
  0x1a   :  { %s197_s4 = scalar_lea.vmem %s40_s24, 256  ;;  %p202_p12 = scmp.lt.s32.totalorder %s40_s24, %s40_s24 }
  0x1b   :  { %p198_p11 = scmp.ne.s32.totalorder %s40_s24, %s197_s4  ;;  %p203_p13 = scmp.lt.s32.totalorder %s197_s4, %s197_s4 }
  0x1d   :  { %p204_p0 = por %p203_p13, %p202_p12 }
  0x1f   :  { %p205_p1 = pnand %p204_p0, %p198_p11 }
  0x21   :  { %208 = shalt.err (!%p205_p1)
}
  0x22   :  { %45 = dma.hbm_to_vmem [thread:$0]  %s294_s1, 256, %s40_s24, [#allocation6], %s238_s19, %s238_s19, %s239_s20  }
  0x23   :  { %231 = dma.done.wait [#allocation3], 256  }
  0x24   :  { %232 = vsyncadd [#allocation3], 4294967040 }
  0x25   :  { %233 = dma.done.wait [#allocation6], 256  }
  0x26   :  { %234 = vsyncadd [#allocation6], 4294967040  ;;  %v66_v0 = vld [vmem:[#allocation2] sm:$0xff]  ;;  %v67_v1 = vld [vmem:[#allocation2 + $0x8] sm:$0xff]  ;;  %s241_s1 = smov [#allocation7]  }
  0x27   :  { %v76_v2 = vand.u32 2147483647, %v66_v0  ;;  %v77_v3 = vand.u32 2147483647, %v67_v1  ;;  %v68_v14 = vld [vmem:[#allocation5] sm:$0xff]  ;;  %v69_v15 = vld [vmem:[#allocation5 + $0x8] sm:$0xff] }
  0x28   :  { %v70_v17 = vmax.f32 %v66_v0, 0.0  ;;  %v72_v18 = vmul.f32 %v68_v14, %v66_v0  ;;  %v71_v21 = vmax.f32 %v67_v1, 0.0  ;;  %v73_v22 = vmul.f32 %v69_v15, %v67_v1  ;;  %s137_s6 = sshll.u32 %s241_s1, 4  ;;  %s138_s6 = int_to_ptr.vmem [resolvable:$true] %s137_s6 }
  0x29   :  { %v78_v4 = vsub.f32 0.0, %v76_v2  ;;  %v79_v5 = vsub.f32 0.0, %v77_v3  ;;  %s209_s7 = scalar_lea.vmem %s138_s6, 128  ;;  %p214_p3 = scmp.lt.s32.totalorder %s138_s6, %s138_s6 }
  0x2a   :  { %v74_v26 = vsub.f32 %v70_v17, %v72_v18  ;;  %v75_v29 = vsub.f32 %v71_v21, %v73_v22  ;;  %p210_p2 = scmp.ne.s32.totalorder %s138_s6, %s209_s7  ;;  %p215_p4 = scmp.lt.s32.totalorder %s209_s7, %s209_s7 }
  0x2b   :  { %v80_v6 = vmul.f32 1.442695, %v78_v4  ;;  %v82_v7 = vmul.f32 1.442695, %v79_v5 }
  0x2c   :  { %p216_p5 = por %p215_p4, %p214_p3 }
  0x2d   :  { %157 = vpow2.f32 %v80_v6 }
  0x2e   :  { %159 = vpow2.f32 %v82_v7  ;;  %p217_p6 = pnand %p216_p5, %p210_p2 }
  0x37   :  { %v158_v8 = vpop.eup %157 }
  0x38   :  { %v160_v9 = vpop.eup %159  ;;  %v84_v10 = vadd.f32 1.0, %v158_v8  ;;  %v87_v12 = vmul.f32 -0.5, %v158_v8  ;;  %v90_v19 = vand.u32 2147483647, %v158_v8 }
  0x39   :  { %v93_v11 = vadd.f32 1.0, %v160_v9  ;;  %v96_v13 = vmul.f32 -0.5, %v160_v9  ;;  %v99_v23 = vand.u32 2147483647, %v160_v9 }
  0x3a   :  { %161 = vlog2.f32 %v84_v10  ;;  %v88_v16 = vadd.f32 1.0, %v87_v12  ;;  %vm91_vm0 = vcmp.lt.f32.partialorder %v90_v19, 0.0004427343 }
  0x3b   :  { %163 = vlog2.f32 %v93_v11  ;;  %v97_v20 = vadd.f32 1.0, %v96_v13  ;;  %vm100_vm1 = vcmp.lt.f32.partialorder %v99_v23, 0.0004427343 }
  0x3c   :  { %v89_v24 = vmul.f32 %v158_v8, %v88_v16 }
  0x3d   :  { %v98_v27 = vmul.f32 %v160_v9, %v97_v20 }
  0x44   :  { %v162_v25 = vpop.eup %161 }
  0x45   :  { %v164_v28 = vpop.eup %163  ;;  %v86_v30 = vmul.f32 0.6931472, %v162_v25 }
  0x46   :  { %v95_v31 = vmul.f32 0.6931472, %v164_v28 }
  0x47   :  { %v92_v32 = vsel %vm91_vm0, %v89_v24, %v86_v30 }
  0x48   :  { %v101_v33 = vsel %vm100_vm1, %v98_v27, %v95_v31  ;;  %v102_v34 = vadd.f32 %v92_v32, %v74_v26 }
  0x49   :  { %v103_v35 = vadd.f32 %v101_v33, %v75_v29 }
  0x4b   :  { %v128_v36 = vadd.f32 %v103_v35, %v102_v34 }
  0x4d   :  { %130 = vst [vmem:[#allocation7] sm:$0xff] %v128_v36 }
  0x4e   :  { %220 = shalt.err (!%p217_p6)
}
  0x4f   :  { %s221_s10 = scalar_lea.hbm %s295_s2, 128 }
  0x50   :  { %p222_p7 = scmp.ne.s32.totalorder %s295_s2, %s221_s10  ;;  %p225_p8 = scmp.lt.u32.totalorder %s221_s10, %s295_s2 }
  0x52   :  { %p227_p9 = pnand %p225_p8, %p222_p7 }
  0x54   :  { %230 = shalt.err (!%p227_p9)
}
  0x55   :  { %140 = dma.vmem_to_hbm [thread:$0]  %s138_s6, 128, %s295_s2, [#allocation4]  }
  0x56   :  { %235 = dma.done.wait [#allocation4], 128  }
  0x57   :  { %236 = vsyncadd [#allocation4], 4294967168 }
  0x58   :  { %144 = vsyncpa [#allocation3], 1 }
  0x59   :  { %145 = vsyncpa [#allocation6], 1 }
  0x5a   :  { %146 = vsyncpa [#allocation4], 1 }

</bundles_post_ra>
